<compile_context>
chip_gen: v5e
topology: v5e:2x2
jax: 0.10.0
libtpu: 0.0.40
codegen_flags: <defaults>
</compile_context>

<pallas_src>
import jax
import jax.numpy as jnp
from jax import lax
from jax.experimental import pallas as pl
from jax.experimental.pallas import tpu as pltpu


def _mlp_kernel(x_ref, w1t_ref, b1t_ref, w2t_ref, b2_ref, o_ref):
    # x:   (TN, D) f32 (cast to compute dtype in-kernel)
    # w1t: (H, D)  bf16   | b1t: (H, 1) f32
    # w2t: (1, H)  bf16   | b2:  (1, 1) f32 in SMEM
    # o:   (1, TN) f32    (lane-dense)
    x = x_ref[...].astype(w1t_ref.dtype)                       # (TN, D)
    # h^T = W1^T . x^T  -- contract last dims of both operands (q@k.T pattern);
    # avoids any (TN, H) relayout and fills the full MXU width with TN.
    ht = lax.dot_general(
        w1t_ref[...], x,
        dimension_numbers=(((1,), (1,)), ((), ())),
        preferred_element_type=jnp.float32,
    )                                                          # (H, TN) f32
    ht = jnp.maximum(ht + b1t_ref[...], 0.0)                   # bias + ReLU, f32
    ht = ht.astype(w2t_ref.dtype)                              # (H, TN) bf16
    y = jnp.dot(w2t_ref[...], ht,
                preferred_element_type=jnp.float32)            # (1, TN) f32
    o_ref[...] = (y + b2_ref[0, 0]).astype(o_ref.dtype)


def _round_up(x, m):
    return ((x + m - 1) // m) * m


def ignore_elems_forward(bispectrum, elems, params, *, tile_n=8192,
                         compute_dtype=jnp.bfloat16):
    """IgnoreElems.forward: applies the subnet to `bispectrum`, ignores `elems`."""
    del elems  # the whole point of IgnoreElems: element labels are unused
    w1, b1, w2, b2 = params
    n, d = bispectrum.shape
    h = w1.shape[1]

    # Row tile: multiple of 128 (lane-dense output), capped at 16384 rows so
    # the VMEM footprint fits v7x, and capped at ~n/2 so the parallel grid
    # axis has >= 2 steps for the two v7x TensorCores whenever possible.
    n128 = _round_up(max(n, 1), 128)
    tile = min(_round_up(tile_n, 128), n128, 16384)
    if n128 >= 2 * 128:
        tile = min(tile, _round_up(pl.cdiv(n128, 2), 128))
    grid_n = pl.cdiv(n, tile)
    n_pad = grid_n * tile

    # Small parameters, reshaped for the transposed formulation.
    w1t = jnp.transpose(w1).astype(compute_dtype)          # (H, D)  == W1^T
    b1t = jnp.reshape(b1, (h, 1)).astype(jnp.float32)      # (H, 1)
    w2t = jnp.reshape(w2, (1, h)).astype(compute_dtype)    # (1, H)  == W2^T
    b2s = jnp.reshape(b2, (1, 1)).astype(jnp.float32)      # (1, 1) scalar -> SMEM

    # 3-deep input pipeline only helps when the grid is long enough (v5e DMA
    # jitter); keep plain double-buffering for short grids.
    if grid_n >= 3:
        x_spec = pl.BlockSpec((tile, d), lambda i: (i, 0),
                              pipeline_mode=pl.Buffered(3))
    else:
        x_spec = pl.BlockSpec((tile, d), lambda i: (i, 0))

    out = pl.pallas_call(
        _mlp_kernel,
        out_shape=jax.ShapeDtypeStruct((1, n_pad), jnp.float32),
        grid_spec=pltpu.PrefetchScalarGridSpec(
            num_scalar_prefetch=0,
            grid=(grid_n,),
            in_specs=[
                x_spec,                                        # per-atom rows (f32)
                pl.BlockSpec((h, d), lambda i: (0, 0)),        # W1^T resident
                pl.BlockSpec((h, 1), lambda i: (0, 0)),        # b1 (column)
                pl.BlockSpec((1, h), lambda i: (0, 0)),        # W2^T
                pl.BlockSpec(memory_space=pltpu.MemorySpace.SMEM),  # b2 scalar
            ],
            out_specs=pl.BlockSpec((1, tile), lambda i: (0, i)),    # lane-dense
        ),
        compiler_params=pltpu.CompilerParams(
            dimension_semantics=("parallel",),
            vmem_limit_bytes=48 * 1024 * 1024,
        ),
        cost_estimate=pl.CostEstimate(
            flops=2 * n_pad * d * h + 2 * n_pad * h,
            transcendentals=0,
            bytes_accessed=n * d * 4 + n_pad * 4 + d * h * 2 + h * 4 + h * 2 + 4,
        ),
    )(bispectrum, w1t, b1t, w2t, b2s)

    # (1, N_pad) -> (N, 1); padded / out-of-bounds rows sliced off.
    return out.reshape(n_pad, 1)[:n]


def make_params(key, d, h):
    """Deterministic subnet parameters (torch.nn.Linear-style uniform init)."""
    k1, k2, k3, k4 = jax.random.split(key, 4)
    bound1 = 1.0 / jnp.sqrt(d)
    bound2 = 1.0 / jnp.sqrt(h)
    w1 = jax.random.uniform(k1, (d, h), jnp.float32, -bound1, bound1)
    b1 = jax.random.uniform(k2, (1, h), jnp.float32, -bound1, bound1)
    w2 = jax.random.uniform(k3, (h, 1), jnp.float32, -bound2, bound2)
    b2 = jax.random.uniform(k4, (1, 1), jnp.float32, -bound2, bound2)
    return w1, b1, w2, b2


def reference_forward(bispectrum, elems, params, compute_dtype=jnp.bfloat16):
    """Module math (natural orientation), bf16 operands / f32 accumulation."""
    del elems
    w1, b1, w2, b2 = params
    x = bispectrum.astype(compute_dtype)
    h = jnp.dot(x, w1.astype(compute_dtype), preferred_element_type=jnp.float32)
    h = jnp.maximum(h + b1, 0.0).astype(compute_dtype)
    y = jnp.dot(h, w2.astype(compute_dtype), preferred_element_type=jnp.float32)
    return y + b2


if __name__ == "__main__":
    key = jax.random.PRNGKey(0)
    k_x, k_e, k_p, k_x2, k_e2, k_x3, k_e3 = jax.random.split(key, 7)

    n_desc, hidden = 32, 128
    params = make_params(k_p, n_desc, hidden)

    # 1) Tiny problem (n < 128): single partial block — exercises edge-block
    #    handling now that the wrapper no longer zero-pads the input.
    n1 = 64
    bis1 = jax.random.normal(k_x, (n1, n_desc), jnp.float32)
    el1 = jax.random.randint(k_e, (n1,), 0, 3, jnp.int32)   # ignored
    out1 = jax.block_until_ready(ignore_elems_forward(bis1, el1, params))
    ref1 = reference_forward(bis1, el1, params)
    assert out1.shape == (n1, 1)
    assert jnp.allclose(out1, ref1, atol=1e-3, rtol=1e-3), \
        float(jnp.max(jnp.abs(out1 - ref1)))

    # 2) Non-divisible atom count + multi-step grid: exercises the Buffered(3)
    #    input pipeline and a partial trailing block.
    n2 = 300
    bis2 = jax.random.normal(k_x2, (n2, n_desc), jnp.float32)
    el2 = jax.random.randint(k_e2, (n2,), 0, 3, jnp.int32)   # ignored
    out2 = jax.block_until_ready(
        ignore_elems_forward(bis2, el2, params, tile_n=128))
    ref2 = reference_forward(bis2, el2, params)
    assert out2.shape == (n2, 1)
    assert jnp.allclose(out2, ref2, atol=1e-3, rtol=1e-3), \
        float(jnp.max(jnp.abs(out2 - ref2)))

    # 3) Default-tile path with the >=2-grid-step (megacore) split.
    n3 = 1000
    bis3 = jax.random.normal(k_x3, (n3, n_desc), jnp.float32)
    el3 = jax.random.randint(k_e3, (n3,), 0, 3, jnp.int32)   # ignored
    out3 = jax.block_until_ready(ignore_elems_forward(bis3, el3, params))
    ref3 = reference_forward(bis3, el3, params)
    assert out3.shape == (n3, 1)
    assert jnp.allclose(out3, ref3, atol=1e-3, rtol=1e-3), \
        float(jnp.max(jnp.abs(out3 - ref3)))

    print("KERNEL_OK")
</pallas_src>

<mosaic_0001>
module attributes {stable_mosaic.version = 11 : i64} {
  func.func @_mlp_kernel(%arg0: i32, %arg1: memref<128x32xf32, #tpu.memory_space<vmem>>, %arg2: memref<128x32xbf16, #tpu.memory_space<vmem>>, %arg3: memref<128x1xf32, #tpu.memory_space<vmem>>, %arg4: memref<1x128xbf16, #tpu.memory_space<vmem>>, %arg5: memref<1x1xf32, #tpu.memory_space<smem>>, %arg6: memref<1x128xf32, #tpu.memory_space<vmem>>) attributes {dimension_semantics = [#tpu.dimension_semantics<parallel>], iteration_bounds = array<i64: 1>, scalar_prefetch = 0 : i64, scratch_operands = 0 : i64, tpu.core_type = #tpu.core_type<tc>, window_params = [{transform_indices = @transform_0, window_bounds = array<i64: 128, 32>}, {pipeline_mode = #tpu.pipeline_mode<synchronous>, transform_indices = @transform_1, window_bounds = array<i64: 128, 32>}, {pipeline_mode = #tpu.pipeline_mode<synchronous>, transform_indices = @transform_2, window_bounds = array<i64: 128, 1>}, {pipeline_mode = #tpu.pipeline_mode<synchronous>, transform_indices = @transform_3, window_bounds = array<i64: 1, 128>}, {transform_indices = @transform_4, window_bounds = array<i64: 1, 1>}, {transform_indices = @transform_5, window_bounds = array<i64: 1, 128>}]} {
    %c0 = arith.constant 0 : index
    %c0_0 = arith.constant 0 : index
    %0 = vector.load %arg1[%c0, %c0_0] : memref<128x32xf32, #tpu.memory_space<vmem>>, vector<128x32xf32>
    %1 = arith.truncf %0 : vector<128x32xf32> to vector<128x32xbf16>
    %c0_1 = arith.constant 0 : index
    %c0_2 = arith.constant 0 : index
    %2 = vector.load %arg2[%c0_1, %c0_2] : memref<128x32xbf16, #tpu.memory_space<vmem>>, vector<128x32xbf16>
    %cst = arith.constant dense<0.000000e+00> : vector<128x128xf32>
    %3 = tpu.matmul %2, %1, %cst {dimension_numbers = #tpu.dot_dimension_numbers<[1], [1], [0], [0], [0, 0, 1, 0], [], []>} : vector<128x32xbf16>, vector<128x32xbf16>, vector<128x128xf32> -> vector<128x128xf32>
    %c0_3 = arith.constant 0 : index
    %c0_4 = arith.constant 0 : index
    %4 = vector.load %arg3[%c0_3, %c0_4] : memref<128x1xf32, #tpu.memory_space<vmem>>, vector<128x1xf32>
    %5 = vector.broadcast %4 : vector<128x1xf32> to vector<128x128xf32>
    %6 = arith.addf %3, %5 : vector<128x128xf32>
    %cst_5 = arith.constant 0.000000e+00 : f32
    %7 = vector.broadcast %cst_5 : f32 to vector<128x128xf32>
    %8 = arith.maximumf %6, %7 : vector<128x128xf32>
    %9 = arith.truncf %8 : vector<128x128xf32> to vector<128x128xbf16>
    %c0_6 = arith.constant 0 : index
    %c0_7 = arith.constant 0 : index
    %10 = vector.load %arg4[%c0_6, %c0_7] : memref<1x128xbf16, #tpu.memory_space<vmem>>, vector<1x128xbf16>
    %cst_8 = arith.constant dense<0.000000e+00> : vector<1x128xf32>
    %11 = tpu.matmul %10, %9, %cst_8 {dimension_numbers = #tpu.dot_dimension_numbers<[1], [0], [0], [1], [0, 0, 1, 1], [], []>} : vector<1x128xbf16>, vector<128x128xbf16>, vector<1x128xf32> -> vector<1x128xf32>
    %c0_9 = arith.constant 0 : index
    %c0_10 = arith.constant 0 : index
    %12 = memref.load %arg5[%c0_9, %c0_10] : memref<1x1xf32, #tpu.memory_space<smem>>
    %13 = vector.broadcast %12 : f32 to vector<1x128xf32>
    %14 = arith.addf %11, %13 : vector<1x128xf32>
    %c0_11 = arith.constant 0 : index
    %c0_12 = arith.constant 0 : index
    %15 = vector.load %arg6[%c0_11, %c0_12] : memref<1x128xf32, #tpu.memory_space<vmem>>, vector<1x128xf32>
    tpu.vector_store %arg6[%c0_11, %c0_12], %14 {strides = array<i32>} : memref<1x128xf32, #tpu.memory_space<vmem>>, vector<1x128xf32>,
    return
  }
  func.func @transform_0(%arg0: i32) -> (i32, i32) {
    %c0_i32 = arith.constant 0 : i32
    %c0_i32_0 = arith.constant 0 : i32
    return %arg0, %c0_i32 : i32, i32
  }
  func.func @transform_1(%arg0: i32) -> (i32, i32) {
    %c0_i32 = arith.constant 0 : i32
    %c0_i32_0 = arith.constant 0 : i32
    %c0_i32_1 = arith.constant 0 : i32
    return %c0_i32, %c0_i32_0 : i32, i32
  }
  func.func @transform_2(%arg0: i32) -> (i32, i32) {
    %c0_i32 = arith.constant 0 : i32
    %c0_i32_0 = arith.constant 0 : i32
    %c0_i32_1 = arith.constant 0 : i32
    return %c0_i32, %c0_i32_0 : i32, i32
  }
  func.func @transform_3(%arg0: i32) -> (i32, i32) {
    %c0_i32 = arith.constant 0 : i32
    %c0_i32_0 = arith.constant 0 : i32
    %c0_i32_1 = arith.constant 0 : i32
    return %c0_i32, %c0_i32_0 : i32, i32
  }
  func.func @transform_4(%arg0: i32) -> (i32, i32) {
    %c0_i32 = arith.constant 0 : i32
    %c0_i32_0 = arith.constant 0 : i32
    %c0_i32_1 = arith.constant 0 : i32
    return %c0_i32, %c0_i32_0 : i32, i32
  }
  func.func @transform_5(%arg0: i32) -> (i32, i32) {
    %c0_i32 = arith.constant 0 : i32
    %c0_i32_0 = arith.constant 0 : i32
    return %c0_i32, %arg0 : i32, i32
  }
}

</mosaic_0001>

<bundles_post_ra>
// kernel: tpu_custom_call.1
= control target key start
LH: loop header
LB: loop body
LE: loop exit
PB: predicated region body
PF: predicated region fallthrough
CT: control target
= control target key end

     0   :  { %vm198_vm0 = vcmask 261120   ;;  %s633_s0 = inlined_call_operand.vmem [shape: f32[64,32], index: 0, kind: input, shape index: {}]   ;;  %s634_s1 = inlined_call_operand.vmem [shape: bf16[128,32], index: 1, kind: input, shape index: {}]   ;;  %s635_s2 = inlined_call_operand.vmem [shape: f32[128,1], index: 2, kind: input, shape index: {}]   ;;  %s636_s3 = inlined_call_operand.vmem [shape: bf16[1,128], index: 3, kind: input, shape index: {}]   ;;  %s637_s4 = inlined_call_operand.<no memory space> [shape: f32[1,1], index: 4, kind: input, shape index: {}]   ;;  %s638_s5 = inlined_call_operand.hbm [shape: f32[1,128], index: 5, kind: output, shape index: {}]  }
   0x1   :  { %v36_v0 = vld [vmem:[%s633_s0 + $0x70] sm:$0xff]  ;;  %v37_v1 = vld [vmem:[%s633_s0 + $0x78] sm:$0xff]  ;;  %v34_v3 = vld [vmem:[%s633_s0 + $0x60] sm:$0xff] }
   0x2   :  { %v45_v2 = vpack.c.bf16 %v37_v1, %v36_v0  ;;  %v35_v4 = vld [vmem:[%s633_s0 + $0x68] sm:$0xff] }
   0x4   :  { %v245_v5 = vsel %vm198_vm0, %v45_v2, 0 }
   0x5   :  { %11 = vsyncpa [#allocation4], 0  ;;  %403 = vmatpush.bf16.xpose.msra.mxu3 %v245_v5  ;;  %402 = vmatpush.bf16.xpose.msra.mxu2 %v245_v5  ;;  %v44_v6 = vpack.c.bf16 %v35_v4, %v34_v3  ;;  %v32_v8 = vld [vmem:[%s633_s0 + $0x50] sm:$0xff]  ;;  %v33_v9 = vld [vmem:[%s633_s0 + $0x58] sm:$0xff]  ;;  %v456_v25 = vmov 0   ;;  %s457_s23 = smov [#allocation3]  }
   0x6   :  { %401 = vmatpush.bf16.xpose.msra.mxu1 %v245_v5  ;;  %247 = vmatpush.bf16.xpose.msra.mxu0 %v245_v5  ;;  %v43_v10 = vpack.c.bf16 %v33_v9, %v32_v8  ;;  %v30_v12 = vld [vmem:[%s633_s0 + $0x40] sm:$0xff]  ;;  %v31_v13 = vld [vmem:[%s633_s0 + $0x48] sm:$0xff]  ;;  %v28_v16 = vld [vmem:[%s633_s0 + $0x30] sm:$0xff]  ;;  %s342_s24 = sshll.u32 %s457_s23, 4  ;;  %s344_s27 = sshll.u32 %s638_s5, 4  ;;  %s343_s24 = int_to_ptr.vmem [resolvable:$true] %s342_s24  ;;  %s345_s27 = int_to_ptr.hbm [resolvable:$true] %s344_s27 }
   0x7   :  { %v242_v7 = vsel %vm198_vm0, %v44_v6, 0  ;;  %v42_v14 = vpack.c.bf16 %v31_v13, %v30_v12  ;;  %v29_v17 = vld [vmem:[%s633_s0 + $0x38] sm:$0xff]  ;;  %v26_v20 = vld [vmem:[%s633_s0 + $0x20] sm:$0xff]  ;;  %v27_v21 = vld [vmem:[%s633_s0 + $0x28] sm:$0xff]  ;;  %427 = vset.pattern.permute.xlu0 %v456_v25  ;;  %428 = vset.pattern.permute.xlu1 %v456_v25 }
   0x8   :  { %v239_v11 = vsel %vm198_vm0, %v43_v10, 0  ;;  %v41_v18 = vpack.c.bf16 %v29_v17, %v28_v16  ;;  %v76_v22 = vld [vmem:[%s635_s2 + $0x70] sm:$0xff]  ;;  %v74_v23 = vld [vmem:[%s635_s2 + $0x60] sm:$0xff]  ;;  %v40_v24 = vpack.c.bf16 %v27_v21, %v26_v20  ;;  %429 = vset.pattern.permute.xlu2 %v456_v25  ;;  %v25_v28 = vld [vmem:[%s633_s0 + $0x18] sm:$0xff] }
   0x9   :  { %v236_v15 = vsel %vm198_vm0, %v42_v14, 0  ;;  %150 = vperm.xlu0 %427, %v76_v22   ;;  %140 = vperm.xlu1 %428, %v74_v23   ;;  %v24_v27 = vld [vmem:[%s633_s0 + $0x10] sm:$0xff]  ;;  %v77_v29 = vld [vmem:[%s635_s2 + $0x78] sm:$0xff]  ;;  %v22_v32 = vld [vmem:[%s633_s0] sm:$0xff] }
   0xa   :  { %v233_v19 = vsel %vm198_vm0, %v41_v18, 0  ;;  %v230_v26 = vsel %vm198_vm0, %v40_v24, 0  ;;  %v39_v30 = vpack.c.bf16 %v25_v28, %v24_v27  ;;  %v23_v33 = vld [vmem:[%s633_s0 + $0x8] sm:$0xff]  ;;  %v70_v35 = vld [vmem:[%s635_s2 + $0x40] sm:$0xff]  ;;  %v69_v39 = vld [vmem:[%s635_s2 + $0x38] sm:$0xff] }
   0xb   :  { %v75_v34 = vld [vmem:[%s635_s2 + $0x68] sm:$0xff]  ;;  %v38_v36 = vpack.c.bf16 %v23_v33, %v22_v32  ;;  %v396_v41 = vld [vmem:[%s634_s1 + $0x18] sm:$0xff]  ;;  %v393_v43 = vld [vmem:[%s634_s1] sm:$0xff] }
   0xc   :  { %v227_v31 = vsel %vm198_vm0, %v39_v30, 0  ;;  %v71_v38 = vld [vmem:[%s635_s2 + $0x48] sm:$0xff]  ;;  %v72_v44 = vld [vmem:[%s635_s2 + $0x50] sm:$0xff]  ;;  %v66_v45 = vld [vmem:[%s635_s2 + $0x20] sm:$0xff] }
   0xd   :  { %406 = vmatpush.bf16.xpose.msra.mxu3 %v242_v7  ;;  %405 = vmatpush.bf16.xpose.msra.mxu2 %v242_v7  ;;  %v224_v37 = vsel %vm198_vm0, %v38_v36, 0  ;;  %v398_v40 = vld [vmem:[%s634_s1 + $0x28] sm:$0xff]  ;;  %v64_v46 = vld [vmem:[%s635_s2 + $0x10] sm:$0xff]  ;;  %v73_v47 = vld [vmem:[%s635_s2 + $0x58] sm:$0xff] }
   0xe   :  { %404 = vmatpush.bf16.xpose.msra.mxu1 %v242_v7  ;;  %248 = vmatpush.bf16.xpose.msra.mxu0 %v242_v7  ;;  %v394_v42 = vld [vmem:[%s634_s1 + $0x8] sm:$0xff]  ;;  %v65_v48 = vld [vmem:[%s635_s2 + $0x18] sm:$0xff]  ;;  %v399_v50 = vld [vmem:[%s634_s1 + $0x30] sm:$0xff] }
   0xf   :  { %130 = vperm.xlu2 %429, %v72_v44   ;;  %v63_v49 = vld [vmem:[%s635_s2 + $0x8] sm:$0xff]  ;;  %v397_v51 = vld [vmem:[%s634_s1 + $0x20] sm:$0xff]  ;;  %v395_v52 = vld [vmem:[%s634_s1 + $0x10] sm:$0xff] }
  0x10   :  { %v68_v53 = vld [vmem:[%s635_s2 + $0x30] sm:$0xff]  ;;  %v67_v54 = vld [vmem:[%s635_s2 + $0x28] sm:$0xff]  ;;  %v400_v55 = vld [vmem:[%s634_s1 + $0x38] sm:$0xff] }
  0x11   :  { %155 = vperm.xlu0 %427, %v77_v29   ;;  %145 = vperm.xlu1 %428, %v75_v34   ;;  %v62_v56 = vld [vmem:[%s635_s2] sm:$0xff] }
  0x15   :  { %409 = vmatpush.bf16.xpose.msra.mxu3 %v239_v11  ;;  %408 = vmatpush.bf16.xpose.msra.mxu2 %v239_v11 }
  0x16   :  { %407 = vmatpush.bf16.xpose.msra.mxu1 %v239_v11  ;;  %249 = vmatpush.bf16.xpose.msra.mxu0 %v239_v11 }
  0x17   :  { %135 = vperm.xlu2 %429, %v73_v47  }
  0x19   :  { %120 = vperm.xlu0 %427, %v70_v35   ;;  %125 = vperm.xlu1 %428, %v71_v38  }
  0x1d   :  { %412 = vmatpush.bf16.xpose.msra.mxu3 %v236_v15  ;;  %411 = vmatpush.bf16.xpose.msra.mxu2 %v236_v15 }
  0x1e   :  { %410 = vmatpush.bf16.xpose.msra.mxu1 %v236_v15  ;;  %250 = vmatpush.bf16.xpose.msra.mxu0 %v236_v15 }
  0x1f   :  { %110 = vperm.xlu2 %429, %v68_v53  }
  0x21   :  { %115 = vperm.xlu0 %427, %v69_v39   ;;  %100 = vperm.xlu1 %428, %v66_v45  }
  0x25   :  { %415 = vmatpush.bf16.xpose.msra.mxu3 %v233_v19  ;;  %414 = vmatpush.bf16.xpose.msra.mxu2 %v233_v19 }
  0x26   :  { %413 = vmatpush.bf16.xpose.msra.mxu1 %v233_v19  ;;  %251 = vmatpush.bf16.xpose.msra.mxu0 %v233_v19 }
  0x27   :  { %105 = vperm.xlu2 %429, %v67_v54  }
  0x29   :  { %90 = vperm.xlu0 %427, %v64_v46   ;;  %95 = vperm.xlu1 %428, %v65_v48  }
  0x2d   :  { %418 = vmatpush.bf16.xpose.msra.mxu3 %v230_v26  ;;  %417 = vmatpush.bf16.xpose.msra.mxu2 %v230_v26 }
  0x2e   :  { %416 = vmatpush.bf16.xpose.msra.mxu1 %v230_v26  ;;  %252 = vmatpush.bf16.xpose.msra.mxu0 %v230_v26 }
  0x2f   :  { %80 = vperm.xlu2 %429, %v62_v56  }
  0x31   :  { %85 = vperm.xlu0 %427, %v63_v49  }
  0x35   :  { %421 = vmatpush.bf16.xpose.msra.mxu3 %v227_v31  ;;  %420 = vmatpush.bf16.xpose.msra.mxu2 %v227_v31 }
  0x36   :  { %419 = vmatpush.bf16.xpose.msra.mxu1 %v227_v31  ;;  %253 = vmatpush.bf16.xpose.msra.mxu0 %v227_v31 }
  0x3d   :  { %424 = vmatpush.bf16.xpose.msra.mxu3 %v224_v37  ;;  %423 = vmatpush.bf16.xpose.msra.mxu2 %v224_v37 }
  0x3e   :  { %422 = vmatpush.bf16.xpose.msra.mxu1 %v224_v37  ;;  %254 = vmatpush.bf16.xpose.msra.mxu0 %v224_v37 }
  0x44   :  { %390 = vmatmul.msk.bf16.vlgmr.msra.gmra.mxu3 %vm198_vm0, %v398_v40  ;;  %388 = vmatmul.msk.bf16.vlgmr.msra.gmra.mxu2 %vm198_vm0, %v396_v41 }
  0x45   :  { %386 = vmatmul.msk.bf16.vlgmr.msra.gmra.mxu1 %vm198_vm0, %v394_v42  ;;  %385 = vmatmul.msk.bf16.vlgmr.msra.gmra.mxu0 %vm198_vm0, %v393_v43 }
  0x54   :  { %391 = vmatmul.msk.bf16.gmra.mxu3 %vm198_vm0, %v399_v50  ;;  %389 = vmatmul.msk.bf16.gmra.mxu2 %vm198_vm0, %v397_v51 }
  0x55   :  { %387 = vmatmul.msk.bf16.gmra.mxu1 %vm198_vm0, %v395_v52 }
  0x64   :  { %392 = vmatmul.msk.bf16.gmra.mxu3 %vm198_vm0, %v400_v55 }
  0x69   :  { %v131_v0 = vpop.permute.xlu2 %130 }
  0x71   :  { %v136_v6 = vpop.permute.xlu2 %135 }
  0x79   :  { %v111_v16 = vpop.permute.xlu2 %110 }
  0x7b   :  { %v151_v59 = vpop.permute.xlu0 %150  ;;  %v141_v62 = vpop.permute.xlu1 %140 }
  0x81   :  { %v106_v35 = vpop.permute.xlu2 %105 }
  0x83   :  { %v156_v63 = vpop.permute.xlu0 %155  ;;  %v146_v4 = vpop.permute.xlu1 %145 }
  0x89   :  { %v81_v54 = vpop.permute.xlu2 %80 }
  0x8b   :  { %v121_v5 = vpop.permute.xlu0 %120  ;;  %v126_v10 = vpop.permute.xlu1 %125 }
  0x93   :  { %v116_v13 = vpop.permute.xlu0 %115  ;;  %v101_v27 = vpop.permute.xlu1 %100 }
  0x9b   :  { %v91_v33 = vpop.permute.xlu0 %90  ;;  %v96_v47 = vpop.permute.xlu1 %95 }
  0xa3   :  { %v86_v51 = vpop.permute.xlu0 %85 }
  0xc2   :  { %v261_v1 = vpop.f32.mrf.mxu1  ;;  %v256_v36 = vpop.f32.mrf.mxu0 }
  0xc3   :  { %v262_v48 = vadd.f32 %v261_v1, %v91_v33  ;;  %v320_v1 = vld [vmem:[%s636_s3] sm:$0x1] }
  0xc5   :  { %v298_v56 = vmax.f32 %v262_v48, 0.0 }
  0xc7   :  { %v281_v57 = vpop.f32.mrf.mxu3  ;;  %v271_v60 = vpop.f32.mrf.mxu2 }
  0xc8   :  { %v282_v25 = vadd.f32 %v281_v57, %v131_v0  ;;  %v272_v34 = vadd.f32 %v271_v60, %v111_v16 }
  0xca   :  { %v263_v8 = vpop.f32.mrf.mxu1  ;;  %v306_v32 = vmax.f32 %v282_v25, 0.0  ;;  %v302_v42 = vmax.f32 %v272_v34, 0.0  ;;  %v258_v55 = vpop.f32.mrf.mxu0 }
  0xcb   :  { %v264_v50 = vadd.f32 %v263_v8, %v96_v47 }
  0xcd   :  { %v299_v57 = vmax.f32 %v264_v50, 0.0 }
  0xcf   :  { %v283_v58 = vpop.f32.mrf.mxu3  ;;  %v273_v3 = vpop.f32.mrf.mxu2 }
  0xd0   :  { %v284_v21 = vadd.f32 %v283_v58, %v136_v6  ;;  %v274_v37 = vadd.f32 %v273_v3, %v116_v13  ;;  %v257_v58 = vadd.f32 %v256_v36, %v81_v54 }
  0xd2   :  { %v266_v20 = vpop.f32.mrf.mxu1  ;;  %v307_v28 = vmax.f32 %v284_v21, 0.0  ;;  %v303_v43 = vmax.f32 %v274_v37, 0.0 }
  0xd3   :  { %v267_v44 = vadd.f32 %v266_v20, %v101_v27 }
  0xd4   :  { %v317_v40 = vpack.c.bf16 %v307_v28, %v306_v32  ;;  %v315_v53 = vpack.c.bf16 %v303_v43, %v302_v42 }
  0xd5   :  { %v300_v49 = vmax.f32 %v267_v44, 0.0 }
  0xd7   :  { %v286_v61 = vpop.f32.mrf.mxu3  ;;  %v276_v9 = vpop.f32.mrf.mxu2 }
  0xd8   :  { %v287_v17 = vadd.f32 %v286_v61, %v141_v62  ;;  %v277_v29 = vadd.f32 %v276_v9, %v121_v5  ;;  %v296_v61 = vmax.f32 %v257_v58, 0.0 }
  0xda   :  { %v308_v26 = vmax.f32 %v287_v17, 0.0  ;;  %v304_v38 = vmax.f32 %v277_v29, 0.0  ;;  %v268_v41 = vpop.f32.mrf.mxu1 }
  0xdb   :  { %v269_v45 = vadd.f32 %v268_v41, %v106_v35 }
  0xdd   :  { %v301_v52 = vmax.f32 %v269_v45, 0.0 }
  0xdf   :  { %v288_v2 = vpop.f32.mrf.mxu3  ;;  %v278_v24 = vpop.f32.mrf.mxu2  ;;  %v314_v60 = vpack.c.bf16 %v301_v52, %v300_v49 }
  0xe0   :  { %v289_v14 = vadd.f32 %v288_v2, %v146_v4  ;;  %v279_v30 = vadd.f32 %v278_v24, %v126_v10  ;;  %v322_v2 = vstv %s637_s4 }
  0xe2   :  { %v309_v22 = vmax.f32 %v289_v14, 0.0  ;;  %v305_v39 = vmax.f32 %v279_v30, 0.0 }
  0xe4   :  { %v318_v31 = vpack.c.bf16 %v309_v22, %v308_v26  ;;  %v316_v46 = vpack.c.bf16 %v305_v39, %v304_v38 }
  0xe7   :  { %v291_v7 = vpop.f32.mrf.mxu3 }
  0xe8   :  { %v292_v11 = vadd.f32 %v291_v7, %v151_v59  ;;  %v259_v59 = vadd.f32 %v258_v55, %v86_v51 }
  0xea   :  { %v310_v18 = vmax.f32 %v292_v11, 0.0  ;;  %v297_v62 = vmax.f32 %v259_v59, 0.0 }
  0xec   :  { %v312_v0 = vpack.c.bf16 %v297_v62, %v296_v61 }
  0xef   :  { %v293_v12 = vpop.f32.mrf.mxu3 }
  0xf0   :  { %v294_v15 = vadd.f32 %v293_v12, %v156_v63  ;;  %v313_v63 = vpack.c.bf16 %v299_v57, %v298_v56 }
  0xf2   :  { %v311_v19 = vmax.f32 %v294_v15, 0.0 }
  0xf4   :  { %v319_v23 = vpack.c.bf16 %v311_v19, %v310_v18 }
  0xf6   :  { %323 = vmatpush.bf16.msrb.mxu1 %v319_v23 }
  0xfa   :  { %324 = vmatpush.bf16.msrb.mxu1 %v318_v31 }
  0xfe   :  { %325 = vmatpush.bf16.msrb.mxu1 %v317_v40 }
 0x102   :  { %326 = vmatpush.bf16.msrb.mxu1 %v316_v46 }
 0x106   :  { %327 = vmatpush.bf16.msrb.mxu1 %v315_v53 }
 0x10a   :  { %328 = vmatpush.bf16.msrb.mxu1 %v314_v60 }
 0x10e   :  { %329 = vmatpush.bf16.msrb.mxu1 %v313_v63 }
 0x112   :  { %330 = vmatpush.bf16.msrb.mxu1 %v312_v0 }
 0x115   :  { %331 = vmatmul.bf16.vlgmr.msrb.gmra.mxu1 %v320_v1 }
 0x192   :  { %v332_v3 = vpop.f32.mrf.mxu1 }
 0x193   :  { %v333_v4 = vadd.f32 %v332_v3, %v322_v2 }
 0x195   :  { %336 = vst [vmem:[#allocation3] sm:$0x1] %v333_v4 }
 0x196   :  { %347 = dma.vmem_to_hbm [thread:$0]  %s343_s24, 16, %s345_s27, [#allocation4]  }
 0x19a   :  { %v334_v5 = vpop.f32.mrf.mxu1 }
 0x19b   :  { %454 = dma.done.wait [#allocation4], 16  }
 0x19c   :  { %455 = vsyncadd [#allocation4], 4294967280 }
 0x19d   :  { %352 = vsyncpa [#allocation4], 1 }

</bundles_post_ra>
